<compile_context>
chip_gen: v7x
topology: tpu7x:2x2x1
jax: 0.10.0
libtpu: 0.0.40
codegen_flags: <defaults>
</compile_context>

<pallas_src>
import functools

import jax
import jax.numpy as jnp
from jax.experimental import pallas as pl
from jax.experimental.pallas import tpu as pltpu


_MIB = 1024 * 1024
_OUT_SUB = 8
_OUT_LANES = 128


def _ceil_div(a, b):
    return -(-a // b)


def _ceil_to(a, b):
    return _ceil_div(a, b) * b


def _sublane(dtype) -> int:
    return {4: 8, 2: 16, 1: 32}.get(jnp.dtype(dtype).itemsize, 8)


def _budget():
    """(target_block_bytes, vmem_limit_bytes) per TPU generation."""
    kind = ""
    try:
        kind = jax.devices()[0].device_kind.lower()
    except Exception:
        pass
    if "v5" in kind or "v6" in kind:
        return 12 * _MIB, 64 * _MIB        # 128 MiB physical VMEM: go big
    if "v7" in kind or "7x" in kind:
        return 8 * _MIB, 48 * _MIB         # 64 MiB physical per TC: stay under
    return 8 * _MIB, 32 * _MIB             # unknown chip: conservative


def _choose_tile_rows(N, V, dtype, target_block_bytes):
    """Largest sublane-multiple row tile within the block budget, keeping >=4 blocks."""
    sub = _sublane(dtype)
    row_bytes = max(1, V * jnp.dtype(dtype).itemsize)
    rows_budget = max(sub, (target_block_bytes // row_bytes) // sub * sub)
    rows_grid = max(sub, _ceil_to(_ceil_div(N, 4), sub))   # keep the grid >= 4 blocks
    return max(sub, min(rows_budget, rows_grid, _ceil_to(N, sub)))


def _translation_loss_kernel(inp_ref, tgt_ref, out_ref, *,
                             padding_idx, n_valid, tile_rows, vocab, chunk):
    tgt = tgt_ref[...]                                      # (TM, 1) int32

    n_full = vocab // chunk
    rem = vocab - n_full * chunk

    def load_chunk_f32(off, width):
        # bf16 stays bf16 in VMEM; cast per-chunk (never a full-tile astype).
        return inp_ref[:, pl.ds(off, width)].astype(jnp.float32)

    # ---------- Pass 1: running row max over vocab chunks ----------
    m = jnp.full((tile_rows, 1), -jnp.inf, dtype=jnp.float32)

    def max_body(c, m_carry):
        off = pl.multiple_of(c * chunk, chunk)
        xc = load_chunk_f32(off, chunk)
        return jnp.maximum(m_carry, jnp.max(xc, axis=-1, keepdims=True))

    if n_full > 0:
        m = jax.lax.fori_loop(0, n_full, max_body, m, unroll=(n_full <= 8))
    if rem > 0:
        xt = load_chunk_f32(n_full * chunk, rem)
        m = jnp.maximum(m, jnp.max(xt, axis=-1, keepdims=True))

    # ---------- Pass 2: fused exp-sum + one-hot picked (x - m) ----------
    def accum(carry, off, width):
        sum_exp, picked = carry
        xs = load_chunk_f32(off, width) - m                           # (TM, width)
        sum_exp = sum_exp + jnp.sum(jnp.exp(xs), axis=-1, keepdims=True)
        col = off + jax.lax.broadcasted_iota(jnp.int32, xs.shape, 1)
        picked = picked + jnp.sum(jnp.where(col == tgt, xs, 0.0),
                                  axis=-1, keepdims=True)
        return sum_exp, picked

    carry = (jnp.zeros((tile_rows, 1), jnp.float32),
             jnp.zeros((tile_rows, 1), jnp.float32))

    def sum_body(c, carry_in):
        off = pl.multiple_of(c * chunk, chunk)
        return accum(carry_in, off, chunk)

    if n_full > 0:
        carry = jax.lax.fori_loop(0, n_full, sum_body, carry, unroll=(n_full <= 8))
    if rem > 0:
        carry = accum(carry, n_full * chunk, rem)
    sum_exp, picked = carry

    # ---------- Mask padding rows and out-of-range tail rows ----------
    # -log_softmax(x)[r, t] = lse - x[t] = log(sum_exp) - (x[t] - m)
    row = (pl.program_id(0) * tile_rows
           + jax.lax.broadcasted_iota(jnp.int32, (tile_rows, 1), 0))
    valid = (tgt != padding_idx) & (row < n_valid)
    loss_rows = jnp.where(valid, jnp.log(sum_exp) - picked, 0.0)      # (TM, 1)

    # Lane-dense unmasked store of the per-block partial sum.
    out_ref[...] = jnp.full(out_ref.shape, jnp.sum(loss_rows), dtype=out_ref.dtype)


def translation_loss(inp, target, padding_idx, *, tile_rows=None, vocab_chunk=512):
    """inp: (N, V) float (f32 or bf16), target: (N,) int -> scalar float32 loss."""
    N, V = inp.shape
    sub = _sublane(inp.dtype)
    target_block_bytes, vmem_limit = _budget()

    if tile_rows is None:
        tile_rows = _choose_tile_rows(N, V, inp.dtype, target_block_bytes)
    tile_rows = max(sub, _ceil_to(int(tile_rows), sub))

    chunk = max(128, (int(vocab_chunk) // 128) * 128)

    n_blocks = _ceil_div(N, tile_rows)
    n_pad_rows = n_blocks * tile_rows

    # Only the (tiny) targets are padded; the (N, V) logits are never copied.
    # The last block's out-of-range rows are masked inside the kernel.
    tgt = target.astype(jnp.int32)
    if n_pad_rows != N:
        tgt = jnp.pad(tgt, (0, n_pad_rows - N), constant_values=padding_idx)
    tgt2d = tgt.reshape(n_pad_rows, 1)

    kernel = functools.partial(
        _translation_loss_kernel,
        padding_idx=int(padding_idx),
        n_valid=int(N),
        tile_rows=int(tile_rows),
        vocab=int(V),
        chunk=chunk,
    )

    partials = pl.pallas_call(
        kernel,
        out_shape=jax.ShapeDtypeStruct((n_blocks, _OUT_SUB, _OUT_LANES), jnp.float32),
        grid_spec=pltpu.PrefetchScalarGridSpec(
            num_scalar_prefetch=0,
            grid=(n_blocks,),
            in_specs=[
                pl.BlockSpec((tile_rows, V), lambda i: (i, 0)),
                pl.BlockSpec((tile_rows, 1), lambda i: (i, 0)),
            ],
            out_specs=pl.BlockSpec((1, _OUT_SUB, _OUT_LANES), lambda i: (i, 0, 0)),
        ),
        compiler_params=pltpu.CompilerParams(
            dimension_semantics=("parallel",),
            vmem_limit_bytes=int(vmem_limit),
        ),
    )(inp, tgt2d)

    # Tiny final reduction over per-block partial sums.
    return jnp.sum(partials[:, 0, 0])


def _reference_loss(inp, target, padding_idx):
    logp = jax.nn.log_softmax(inp.astype(jnp.float32), axis=-1)
    picked = jnp.take_along_axis(logp, target[:, None].astype(jnp.int32), axis=-1)[:, 0]
    mask = (target != padding_idx).astype(jnp.float32)
    return jnp.sum(-picked * mask)


if __name__ == "__main__":
    key = jax.random.PRNGKey(0)
    padding_idx = 0

    # Shapes implied by the module: (bs*seqlen, vocab_size) logits, (bs*seqlen,) labels.
    bs, seqlen, vocab = 2, 8, 128
    N = bs * seqlen
    k1, k2 = jax.random.split(key)
    logits = jax.random.normal(k1, (N, vocab), dtype=jnp.float32)
    target = jax.random.randint(k2, (N,), 0, vocab, dtype=jnp.int32)
    # Force a few padding positions so the mask path is exercised.
    target = target.at[3].set(padding_idx).at[11].set(padding_idx)

    # 1) Default (auto-derived) row tile, multi-block parallel grid.
    ref = _reference_loss(logits, target, padding_idx)
    loss = jax.block_until_ready(translation_loss(logits, target, padding_idx))
    assert jnp.allclose(loss, ref, rtol=1e-5, atol=1e-4), (loss, ref)

    # 2) Non-divisible N: in-kernel tail-row masking, no logits pad.
    loss2 = jax.block_until_ready(
        translation_loss(logits[:14], target[:14], padding_idx, tile_rows=8))
    ref2 = _reference_loss(logits[:14], target[:14], padding_idx)
    assert jnp.allclose(loss2, ref2, rtol=1e-5, atol=1e-4), (loss2, ref2)

    # 3) Larger vocab: exercises the chunked fori_loop (2 full 512-lane chunks + 128 tail).
    vocab2 = 1152
    k3, k4 = jax.random.split(k1)
    logits3 = jax.random.normal(k3, (N, vocab2), dtype=jnp.float32)
    target3 = jax.random.randint(k4, (N,), 0, vocab2, dtype=jnp.int32)
    target3 = target3.at[0].set(padding_idx)
    loss3 = jax.block_until_ready(translation_loss(logits3, target3, padding_idx))
    ref3 = _reference_loss(logits3, target3, padding_idx)
    assert jnp.allclose(loss3, ref3, rtol=1e-5, atol=1e-4), (loss3, ref3)

    # 4) bf16 logits stay bf16 over the wire (per-chunk f32 cast inside the kernel).
    logits_bf16 = logits.astype(jnp.bfloat16)
    loss4 = jax.block_until_ready(translation_loss(logits_bf16, target, padding_idx))
    ref4 = _reference_loss(logits_bf16, target, padding_idx)
    assert jnp.allclose(loss4, ref4, rtol=1e-5, atol=1e-3), (loss4, ref4)

    print("KERNEL_OK")
</pallas_src>

<mosaic_0001>
module attributes {stable_mosaic.version = 11 : i64} {
  func.func @_translation_loss_kernel(%arg0: i32, %arg1: memref<8x128xf32, #tpu.memory_space<vmem>>, %arg2: memref<8x1xi32, #tpu.memory_space<vmem>>, %arg3: memref<1x8x128xf32, #tpu.memory_space<vmem>>) attributes {dimension_semantics = [#tpu.dimension_semantics<parallel>], iteration_bounds = array<i64: 2>, scalar_prefetch = 0 : i64, scratch_operands = 0 : i64, tpu.core_type = #tpu.core_type<tc>, window_params = [{transform_indices = @transform_0, window_bounds = array<i64: 8, 128>}, {transform_indices = @transform_1, window_bounds = array<i64: 8, 1>}, {transform_indices = @transform_2, window_bounds = array<i64: 1, 8, 128>}]} {
    %c0 = arith.constant 0 : index
    %c0_0 = arith.constant 0 : index
    %0 = vector.load %arg2[%c0, %c0_0] : memref<8x1xi32, #tpu.memory_space<vmem>>, vector<8x1xi32>
    %cst = arith.constant 0xFF800000 : f32
    %1 = vector.broadcast %cst : f32 to vector<8x1xf32>
    %c0_1 = arith.constant 0 : index
    %c0_2 = arith.constant 0 : index
    %2 = vector.load %arg1[%c0_1, %c0_2] : memref<8x128xf32, #tpu.memory_space<vmem>>, vector<8x128xf32>
    %cst_3 = arith.constant dense<0xFF800000> : vector<8xf32>
    %3 = vector.multi_reduction <maximumf>, %2, %cst_3 [1] : vector<8x128xf32> to vector<8xf32>
    %4 = vector.shape_cast %3 : vector<8xf32> to vector<8x1xf32>
    %5 = arith.maximumf %1, %4 : vector<8x1xf32>
    %cst_4 = arith.constant 0.000000e+00 : f32
    %6 = vector.broadcast %cst_4 : f32 to vector<8x1xf32>
    %cst_5 = arith.constant 0.000000e+00 : f32
    %7 = vector.broadcast %cst_5 : f32 to vector<8x1xf32>
    %c0_6 = arith.constant 0 : index
    %c0_7 = arith.constant 0 : index
    %8 = vector.load %arg1[%c0_6, %c0_7] : memref<8x128xf32, #tpu.memory_space<vmem>>, vector<8x128xf32>
    %9 = vector.broadcast %5 : vector<8x1xf32> to vector<8x128xf32>
    %10 = arith.subf %8, %9 : vector<8x128xf32>
    %11 = math.exp %10 : vector<8x128xf32>
    %cst_8 = arith.constant dense<0.000000e+00> : vector<8xf32>
    %12 = vector.multi_reduction <add>, %11, %cst_8 [1] : vector<8x128xf32> to vector<8xf32>
    %13 = vector.shape_cast %12 : vector<8xf32> to vector<8x1xf32>
    %14 = arith.addf %6, %13 : vector<8x1xf32>
    %15 = tpu.iota {dimensions = array<i32: 1>} : vector<8x128xi32>
    %c0_i32 = arith.constant 0 : i32
    %16 = vector.broadcast %c0_i32 : i32 to vector<8x128xi32>
    %17 = arith.addi %16, %15 : vector<8x128xi32>
    %18 = vector.broadcast %0 : vector<8x1xi32> to vector<8x128xi32>
    %19 = arith.cmpi eq, %17, %18 : vector<8x128xi32>
    %cst_9 = arith.constant 0.000000e+00 : f32
    %20 = vector.broadcast %cst_9 : f32 to vector<8x128xf32>
    %21 = arith.select %19, %10, %20 : vector<8x128xi1>, vector<8x128xf32>
    %cst_10 = arith.constant dense<0.000000e+00> : vector<8xf32>
    %22 = vector.multi_reduction <add>, %21, %cst_10 [1] : vector<8x128xf32> to vector<8xf32>
    %23 = vector.shape_cast %22 : vector<8xf32> to vector<8x1xf32>
    %24 = arith.addf %7, %23 : vector<8x1xf32>
    %c8_i32 = arith.constant 8 : i32
    %25 = arith.muli %arg0, %c8_i32 : i32
    %26 = tpu.iota {dimensions = array<i32: 0>} : vector<8x1xi32>
    %27 = vector.broadcast %25 : i32 to vector<8x1xi32>
    %28 = arith.addi %27, %26 : vector<8x1xi32>
    %c0_i32_11 = arith.constant 0 : i32
    %29 = vector.broadcast %c0_i32_11 : i32 to vector<8x1xi32>
    %30 = arith.cmpi ne, %0, %29 : vector<8x1xi32>
    %c16_i32 = arith.constant 16 : i32
    %31 = vector.broadcast %c16_i32 : i32 to vector<8x1xi32>
    %32 = arith.cmpi slt, %28, %31 : vector<8x1xi32>
    %33 = arith.andi %30, %32 : vector<8x1xi1>
    %34 = math.log %14 : vector<8x1xf32>
    %35 = arith.subf %34, %24 : vector<8x1xf32>
    %cst_12 = arith.constant 0.000000e+00 : f32
    %36 = vector.broadcast %cst_12 : f32 to vector<8x1xf32>
    %37 = arith.select %33, %35, %36 : vector<8x1xi1>, vector<8x1xf32>
    %38 = vector.shape_cast %37 : vector<8x1xf32> to vector<1x8x1xf32>
    %cst_13 = arith.constant dense<0.000000e+00> : vector<1xf32>
    %39 = vector.multi_reduction <add>, %38, %cst_13 [1, 2] : vector<1x8x1xf32> to vector<1xf32>
    %40 = vector.shape_cast %39 : vector<1xf32> to vector<1x1x1xf32>
    %41 = vector.extract %40[0, 0, 0] : f32 from vector<1x1x1xf32>
    %42 = vector.broadcast %41 : f32 to vector<1x8x128xf32>
    %c0_14 = arith.constant 0 : index
    %c0_15 = arith.constant 0 : index
    %c0_16 = arith.constant 0 : index
    %43 = vector.load %arg3[%c0_14, %c0_15, %c0_16] : memref<1x8x128xf32, #tpu.memory_space<vmem>>, vector<1x8x128xf32>
    tpu.vector_store %arg3[%c0_14, %c0_15, %c0_16], %42 {strides = array<i32>} : memref<1x8x128xf32, #tpu.memory_space<vmem>>, vector<1x8x128xf32>,
    return
  }
  func.func @transform_0(%arg0: i32) -> (i32, i32) {
    %c0_i32 = arith.constant 0 : i32
    %c0_i32_0 = arith.constant 0 : i32
    return %arg0, %c0_i32 : i32, i32
  }
  func.func @transform_1(%arg0: i32) -> (i32, i32) {
    %c0_i32 = arith.constant 0 : i32
    %c0_i32_0 = arith.constant 0 : i32
    return %arg0, %c0_i32 : i32, i32
  }
  func.func @transform_2(%arg0: i32) -> (i32, i32, i32) {
    %c0_i32 = arith.constant 0 : i32
    %c0_i32_0 = arith.constant 0 : i32
    %c0_i32_1 = arith.constant 0 : i32
    return %arg0, %c0_i32, %c0_i32_0 : i32, i32, i32
  }
}

</mosaic_0001>

<bundles_post_ra>
// kernel: tpu_custom_call.1
= control target key start
LH: loop header
LB: loop body
LE: loop exit
PB: predicated region body
PF: predicated region fallthrough
CT: control target
= control target key end

     0   :  { %7 = vsyncpa [#allocation3], 0  ;;  %s530_s0 = inlined_call_operand.vmem [shape: f32[16,128], index: 0, kind: input, shape index: {}]   ;;  %s531_s1 = inlined_call_operand.vmem [shape: s32[16,1], index: 1, kind: input, shape index: {}]   ;;  %s532_s2 = inlined_call_operand.hbm [shape: f32[2,8,128], index: 2, kind: output, shape index: {}]  }
   0x1   :  { %9 = vsyncpa [#allocation3 + $0x1], 0  ;;  %s426_s9 = smov 0   ;;  %s428_s10 = smov 0  }
   0x2   :  { %s430_s11 = smov 0   ;;  %s432_s12 = smov 0  }
   0x3 LB: > { %s447_s13 = sadd.s32 4294967295, %s407_s12   ;;  %s286_s14 = sadd.s32 4294967294, %s407_s12   ;;  %s407_s12 = sphi %s432_s12, %s538_s12   ;;  %s403_s11 = sphi %s430_s11, %s537_s11   ;;  %s399_s10 = sphi %s428_s10, %s536_s10   ;;  %s395_s9 = sphi %s426_s9, %s535_s9  }
   0x4   : > { %s451_s15 = sadd.s32 1, %s407_s12   ;;  %s74_s16 = sadd.s32 1, %s403_s11 }
   0x5   : > { %s71_s17 = ssub.s32 %s407_s12, %s451_s15  ;;  %p84_p0 = scmp.ne.s32.totalorder %s403_s11, %s399_s10 }
   0x6   : > { %p72_p1 = scmp.eq.s32.totalorder %s71_s17, 0  ;;  %p85_p2 = scmp.eq.s32.totalorder %s447_s13, 1 }
   0x7   : > { %p90_p3 = scmp.ne.s32.totalorder %s399_s10, %s395_s9  ;;  %p91_p4 = scmp.eq.s32.totalorder %s286_s14, 1 }
   0x8   : > { %s462_s18 = scalar_select %p72_p1, %s403_s11, %s74_s16  }
   0x9   : > { %p464_p5 = por %p85_p2, %p84_p0  ;;  %p468_p6 = por %p91_p4, %p90_p3 }
   0xa   : > { %p289_p7 = scmp.ge.s32.totalorder %s407_s12, 1  ;;  %p123_p8 = scmp.lt.s32.totalorder %s407_s12, 3 }
   0xc   : > { %p124_p9 = pnand %p289_p7, %p123_p8 }
   0xd   : > { %p148_p10 = scmp.lt.s32.totalorder (!%p124_p9), %s447_s13, 1  ;;  %v409_v0 = vmov (!%p124_p9), 0   ;;  %v166_v6 = vlaneseq (!%p124_p9)  ;;  %s293_s29 = sshll.u32 (!%p124_p9), %s447_s13, 3  ;;  %vm188_vm4 = vcmask (!%p124_p9), 7168  }
   0xe   : > { %127 = sbr.rel (%p124_p9) target bundleno = 561 (0x231), region = 28  ;;  %340 = vset.pattern.permute.xlu0 (!%p124_p9), %v409_v0  ;;  %v179_v13 = vstv (!%p124_p9), %s293_s29  ;;  %s145_s30 = sand.u32 (!%p124_p9), 1, %s399_s10  }
   0xf   : > { %v167_v7 = vand.u32 (!%p124_p9), 127, %v166_v6  ;;  %v178_v12 = vshrl.u32 (!%p124_p9), %v166_v6, 7  ;;  %s290_s3 = sshll.u32 (!%p124_p9), %s145_s30, 3  ;;  %s295_s6 = sshll.u32 (!%p124_p9), %s447_s13, 7 }
  0x10   : > { %s147_s4 = scalar_lea.vmem (!%p124_p9), [#allocation2], %s290_s3  ;;  %s490_s16 = scalar_lea.hbm (!%p124_p9), %s532_s2, %s295_s6 }
  0x11   : > { %v180_v14 = vadd.s32 (!%p124_p9), %v179_v13, %v178_v12  ;;  %s215_s5 = sshll.u32 (!%p124_p9), %s147_s4, 4  ;;  %s202_s17 = scalar_lea.sflag (!%p124_p9), [#allocation3], %s145_s30  ;;  %s485_s5 = int_to_ptr.vmem [resolvable:$true] %s215_s5 }
  0x13   : > { %vm182_vm2 = vcmp.lt.s32.totalorder (!%p124_p9), %v180_v14, 16 }
  0x15   : > { %s149_s21 = scalar_select %p148_p10, %s447_s13, 1 }
  0x16   : > { %s410_s13 = smov [#allocation2]  }
  0x17   : > { %s291_s22 = sshll.u32 %s149_s21, 3  ;;  %s345_s21 = scalar_lea.vmem %s485_s5, 128 }
  0x18   : > { %s151_s25 = scalar_lea.vmem %s530_s0, %s291_s22  ;;  %s155_s28 = scalar_lea.vmem %s531_s1, %s291_s22 }
  0x19   : > { %v157_v1 = vld [vmem:[%s151_s25] sm:$0xff]  ;;  %p346_p11 = scmp.ne.s32.totalorder %s485_s5, %s345_s21  ;;  %s349_s22 = sshll.u32 %s410_s13, 4  ;;  %s350_s22 = int_to_ptr.vmem [resolvable:$false] %s349_s22 }
  0x1a   : > { %158 = vmax.xlane.f32.xlu0 %v157_v1  ;;  %v156_v2 = vld [vmem:[%s155_s28] sm:$0xff]  ;;  %s351_s23 = scalar_lea.vmem %s350_s22, 256  ;;  %p352_p0 = scmp.lt.s32.totalorder %s485_s5, %s350_s22 }
  0x1b   : > { %vm181_vm1 = vcmp.ne.s32.totalorder %v156_v2, 0  ;;  %p347_p12 = pnand %p346_p11, %p464_p5  ;;  %p353_p1 = scmp.lt.s32.totalorder %s351_s23, %s345_s21 }
  0x1c   : > { %vm183_vm3 = vmand %vm181_vm1, %vm182_vm2 }
  0x1d   : > { %p348_p13 = pneg %p347_p12  ;;  %p354_p2 = por %p353_p1, %p352_p0 }
  0x1f   : > { %p355_p3 = pnand %p354_p2, %p348_p13 }
  0x30   : > { %169 = vperm.xlu0 %340, %v156_v2  }
  0xa7   : > { %v159_v3 = vpop.xlane.xlu0 %158 }
  0xa8   : > { %v160_v4 = vsub.f32 %v157_v1, %v159_v3 }
  0xaa   : > { %v161_v5 = vmul.f32 1.442695, %v160_v4 }
  0xac   : > { %341 = vpow2.f32 %v161_v5 }
  0xaf   : > { %v170_v8 = vpop.permute.xlu0 %169 }
  0xb0   : > { %vm171_vm0 = vcmp.eq.s32.totalorder %v167_v7, %v170_v8 }
  0xb1   : > { %v172_v10 = vsel %vm171_vm0, %v160_v4, 0.0 }
  0xb6   : > { %v342_v9 = vpop.eup %341 }
  0xb7   : > { %163 = vadd.xlane.f32.xlu1 %v342_v9 }
  0xbb   : > { %173 = vadd.xlane.f32.xlu1 %v172_v10 }
 0x144   : > { %v164_v11 = vpop.xlane.xlu1 %163 }
 0x145   : > { %343 = vlog2.f32 %v164_v11 }
 0x148   : > { %v174_v17 = vpop.xlane.xlu1 %173 }
 0x14f   : > { %v344_v15 = vpop.eup %343 }
 0x150   : > { %v185_v16 = vmul.f32 0.6931472, %v344_v15 }
 0x152   : > { %v186_v18 = vsub.f32 %v185_v16, %v174_v17 }
 0x154   : > { %v187_v19 = vsel %vm183_vm3, %v186_v18, 0.0 }
 0x155   : > { %v189_v20 = vsel %vm188_vm4, %v187_v19, 0.0 }
 0x156   : > { %190 = vadd.xlane.f32.xlu1 %v189_v20 }
 0x1e3   : > { %v191_v21 = vpop.xlane.xlu1 %190 }
 0x1e4   : > { %v192_v22 = vrot.slane %v191_v21, 4 }
 0x1e6   : > { %v193_v23 = vadd.f32 %v192_v22, %v191_v21 }
 0x1e8   : > { %v194_v24 = vrot.slane %v193_v23, 2 }
 0x1ea   : > { %v195_v25 = vadd.f32 %v194_v24, %v193_v23 }
 0x1ec   : > { %v196_v26 = vrot.slane %v195_v25, 1 }
 0x1ee   : > { %v197_v27 = vadd.f32 %v196_v26, %v195_v25 }
 0x1f0   : > { %298 = vpush %v197_v27 }
 0x221   : > { %s299_s7 = spop %298 }
 0x222   : > { %v199_v28 = vstv %s299_s7 }
 0x223   : > { %200 = vst [vmem:[%s147_s4] sm:$0xff] %v199_v28 }
 0x224   : > { %358 = shalt.err (!%p355_p3)
}
 0x225   : > { %s359_s24 = scalar_lea.hbm %s490_s16, 128  ;;  %s363_s27 = scalar_lea.hbm %s532_s2, 256 }
 0x226   : > { %p360_p4 = scmp.ne.s32.totalorder %s490_s16, %s359_s24  ;;  %p364_p9 = scmp.lt.u32.totalorder %s490_s16, %s532_s2 }
 0x227   : > { %p365_p10 = scmp.lt.u32.totalorder %s363_s27, %s359_s24  ;;  %p367_p12 = scmp.lt.u32.totalorder %s359_s24, %s490_s16 }
 0x228   : > { %p361_p7 = pnand %p360_p4, %p464_p5 }
 0x229   : > { %p366_p11 = por %p365_p10, %p364_p9 }
 0x22a   : > { %p362_p8 = pneg %p361_p7 }
 0x22b   : > { %p368_p13 = por %p367_p12, %p366_p11 }
 0x22d   : > { %p369_p0 = pnand %p368_p13, %p362_p8 }
 0x22f   : > { %372 = shalt.err (!%p369_p0)
}
 0x230   : > { %300 = dma.vmem_to_hbm [thread:$0]  (%p464_p5), %s485_s5, 128, %s490_s16, %s202_s17  }
 0x231 PF: > { %p306_p1 = scmp.ge.s32.totalorder %s407_s12, 2  ;;  %s227_s30 = sand.u32 1, %s395_s9  }
 0x232   : > { %s228_s3 = scalar_lea.sflag [#allocation3], %s227_s30 }
 0x233   : > { %p303_p2 = pnand %p306_p1, %p468_p6 }
 0x235   : > { %390 = dma.done.wait (!%p303_p2), %s228_s3, 128  }
 0x236   : > { %392 = vsyncadd (!%p303_p2), %s228_s3, 4294967168  ;;  %p12_p3 = scmp.ge.s32.totalorder %s451_s15, 4   ;;  %s535_s9 = smov %s399_s10 }
 0x237   : > { %s536_s10 = smov %s403_s11  ;;  %s537_s11 = smov %s462_s18 }
 0x238   : > { %s538_s12 = smov %s451_s15  ;;  %14 = sbr.rel (!%p12_p3) target bundleno = 3 (0x3), region = 66 }
 0x23f   :  { %233 = vsyncpa [#allocation3], 1 }
 0x240   :  { %235 = vsyncpa [#allocation3 + $0x1], 1 }

</bundles_post_ra>
